<compile_context>
chip_gen: v5e
topology: v5e:2x2
jax: 0.10.0
libtpu: 0.0.40
codegen_flags: <defaults>
</compile_context>

<pallas_src>
import jax
import jax.numpy as jnp
from jax.experimental import pallas as pl
from jax.experimental.pallas import tpu as pltpu


_FASTPATH_MAX_ELEMS = 1 << 17  # below this, one fused XLA pass beats pad + pallas launch


def _round_up(x, m):
    return ((x + m - 1) // m) * m


def _pde_expr_kernel(c_ref, uf_ref, ux_ref, uxxx_ref, o_ref):
    # c_ref: (2,) f32 coefficients in SMEM; feature refs: (bm, c) VMEM tiles.
    c0 = c_ref[0]
    c1 = c_ref[1]
    o_ref[...] = c0 * (uf_ref[...] * ux_ref[...]) + c1 * uxxx_ref[...]


def _slab_geometry(n, tm, tn):
    """Lane-dense 2D slab: lane width c (mult of 128), block rows bm (mult of 8)."""
    c = max(128, min(tn, _round_up(max(n, 1), 128)))
    rows = pl.cdiv(n, c)
    # Prefer >= 8 grid steps (v7x megacore sharding of the row axis) but never
    # shrink blocks below 64 rows (256 KiB/array) unless the data is smaller.
    bm = min(tm, max(_round_up(pl.cdiv(rows, 8), 8), 64))
    bm = max(8, min(bm, _round_up(rows, 8)))
    rows_pad = _round_up(rows, bm)
    return c, bm, rows_pad


def pde_expression_forward(uf, u_x, u_xxx, c0, c1, *, tm=512, tn=1024,
                           min_pallas_elems=_FASTPATH_MAX_ELEMS):
    """c0*uf*u_x + c1*u_xxx elementwise over N points. Returns (N, 1) float32.

    Preferred (SoA) entry point: uf, u_x, u_xxx are contiguous (N,) or (N,1)
    arrays; c0, c1 may be Python floats or JAX scalars (traced values OK).
    """
    uf = jnp.ravel(uf).astype(jnp.float32)
    u_x = jnp.ravel(u_x).astype(jnp.float32)
    u_xxx = jnp.ravel(u_xxx).astype(jnp.float32)
    n = uf.shape[0]
    coeffs = jnp.asarray([c0, c1], dtype=jnp.float32)

    if n < min_pallas_elems:
        # Latency-dominated regime: single fused XLA pass, no pad / launch cost.
        return (coeffs[0] * uf * u_x + coeffs[1] * u_xxx).reshape(n, 1)

    c, bm, rows_pad = _slab_geometry(n, tm, tn)
    n_pad = rows_pad * c

    def slab(f):
        if n_pad != n:
            f = jnp.pad(f, (0, n_pad - n))
        return f.reshape(rows_pad, c)

    grid = (rows_pad // bm,)
    feat_spec = pl.BlockSpec((bm, c), lambda i: (i, 0))

    out = pl.pallas_call(
        _pde_expr_kernel,
        out_shape=jax.ShapeDtypeStruct((rows_pad, c), jnp.float32),
        grid=grid,
        in_specs=[pl.BlockSpec(memory_space=pltpu.MemorySpace.SMEM),  # coeffs
                  feat_spec, feat_spec, feat_spec],
        out_specs=pl.BlockSpec((bm, c), lambda i: (i, 0)),
        compiler_params=pltpu.CompilerParams(
            dimension_semantics=("parallel",),
            vmem_limit_bytes=48 * 1024 * 1024,
            # Let XLA fuse the pad/reshape (and any upstream slice) producers
            # into the pallas_call inputs instead of materializing them in HBM.
            allow_input_fusion=[False, True, True, True],
        ),
        cost_estimate=pl.CostEstimate(
            flops=4 * n_pad, transcendentals=0, bytes_accessed=16 * n_pad),
    )(coeffs, slab(uf), slab(u_x), slab(u_xxx))

    # NOTE: consumers that tolerate a padded result should use `out` directly;
    # the [:n] strip below costs one extra pass over the (small) output.
    return out.reshape(-1)[:n].reshape(n, 1)


def pde_expression_forward_packed(e, c0, c1, **kwargs):
    """PyTorch-compatible entry point: e = cat([uf, u_x, u_xx, u_xxx], dim=1)."""
    n, nfeat = e.shape
    assert nfeat == 4, "expected features (uf, u_x, u_xx, u_xxx)"
    # Column 2 (u_xx) is never read by the expression, so it is never touched.
    return pde_expression_forward(e[:, 0], e[:, 1], e[:, 3], c0, c1, **kwargs)


if __name__ == "__main__":
    # Fixed (lstsq-fit) PDE coefficients held by PDEExpression.
    # Canonical KdV: u_t = -6 * uf * u_x - u_xxx
    C0, C1 = -6.0, -1.0
    key = jax.random.PRNGKey(0)

    # 1) Packed (N,4) interface, small N -> latency fast path.
    N1 = 300
    e1 = jax.random.normal(key, (N1, 4), dtype=jnp.float32)
    out1 = jax.block_until_ready(pde_expression_forward_packed(e1, C0, C1))
    ref1 = C0 * e1[:, 0:1] * e1[:, 1:2] + C1 * e1[:, 3:4]
    assert out1.shape == (N1, 1)
    assert jnp.allclose(out1, ref1, atol=1e-6, rtol=1e-6)

    # 2) Force the Pallas kernel path at a small, ragged N (exercises slab
    #    padding and the SMEM coefficient operand).
    N2 = 4099
    e2 = jax.random.normal(jax.random.PRNGKey(1), (N2, 4), dtype=jnp.float32)
    out2 = jax.block_until_ready(
        pde_expression_forward_packed(e2, C0, C1, min_pallas_elems=0))
    ref2 = C0 * e2[:, 0:1] * e2[:, 1:2] + C1 * e2[:, 3:4]
    assert out2.shape == (N2, 1)
    assert jnp.allclose(out2, ref2, atol=1e-6, rtol=1e-6)

    # 3) Preferred SoA calling convention (no strided column gathers), kernel path.
    uf = jax.random.normal(jax.random.PRNGKey(2), (N2,), dtype=jnp.float32)
    ux = jax.random.normal(jax.random.PRNGKey(3), (N2,), dtype=jnp.float32)
    uxxx = jax.random.normal(jax.random.PRNGKey(4), (N2,), dtype=jnp.float32)
    out3 = jax.block_until_ready(
        pde_expression_forward(uf, ux, uxxx, C0, C1, min_pallas_elems=0))
    ref3 = (C0 * uf * ux + C1 * uxxx).reshape(N2, 1)
    assert jnp.allclose(out3, ref3, atol=1e-6, rtol=1e-6)

    print("KERNEL_OK")
</pallas_src>

<mosaic_0001>
module attributes {stable_mosaic.version = 11 : i64} {
  func.func @_pde_expr_kernel(%arg0: i32, %arg1: memref<2xf32, #tpu.memory_space<smem>>, %arg2: memref<8x1024xf32, #tpu.memory_space<vmem>>, %arg3: memref<8x1024xf32, #tpu.memory_space<vmem>>, %arg4: memref<8x1024xf32, #tpu.memory_space<vmem>>, %arg5: memref<8x1024xf32, #tpu.memory_space<vmem>>) attributes {dimension_semantics = [#tpu.dimension_semantics<parallel>], iteration_bounds = array<i64: 1>, scalar_prefetch = 0 : i64, scratch_operands = 0 : i64, tpu.core_type = #tpu.core_type<tc>, window_params = [{transform_indices = @transform_0, window_bounds = array<i64: 2>}, {transform_indices = @transform_1, window_bounds = array<i64: 8, 1024>}, {transform_indices = @transform_2, window_bounds = array<i64: 8, 1024>}, {transform_indices = @transform_3, window_bounds = array<i64: 8, 1024>}, {transform_indices = @transform_4, window_bounds = array<i64: 8, 1024>}]} {
    %c0 = arith.constant 0 : index
    %0 = memref.load %arg1[%c0] : memref<2xf32, #tpu.memory_space<smem>>
    %c1 = arith.constant 1 : index
    %1 = memref.load %arg1[%c1] : memref<2xf32, #tpu.memory_space<smem>>
    %c0_0 = arith.constant 0 : index
    %c0_1 = arith.constant 0 : index
    %2 = vector.load %arg2[%c0_0, %c0_1] : memref<8x1024xf32, #tpu.memory_space<vmem>>, vector<8x1024xf32>
    %c0_2 = arith.constant 0 : index
    %c0_3 = arith.constant 0 : index
    %3 = vector.load %arg3[%c0_2, %c0_3] : memref<8x1024xf32, #tpu.memory_space<vmem>>, vector<8x1024xf32>
    %4 = arith.mulf %2, %3 : vector<8x1024xf32>
    %5 = vector.broadcast %0 : f32 to vector<8x1024xf32>
    %6 = arith.mulf %5, %4 : vector<8x1024xf32>
    %c0_4 = arith.constant 0 : index
    %c0_5 = arith.constant 0 : index
    %7 = vector.load %arg4[%c0_4, %c0_5] : memref<8x1024xf32, #tpu.memory_space<vmem>>, vector<8x1024xf32>
    %8 = vector.broadcast %1 : f32 to vector<8x1024xf32>
    %9 = arith.mulf %8, %7 : vector<8x1024xf32>
    %10 = arith.addf %6, %9 : vector<8x1024xf32>
    %c0_6 = arith.constant 0 : index
    %c0_7 = arith.constant 0 : index
    %11 = vector.load %arg5[%c0_6, %c0_7] : memref<8x1024xf32, #tpu.memory_space<vmem>>, vector<8x1024xf32>
    tpu.vector_store %arg5[%c0_6, %c0_7], %10 {strides = array<i32>} : memref<8x1024xf32, #tpu.memory_space<vmem>>, vector<8x1024xf32>,
    return
  }
  func.func @transform_0(%arg0: i32) -> i32 {
    %c0_i32 = arith.constant 0 : i32
    %c0_i32_0 = arith.constant 0 : i32
    return %c0_i32 : i32
  }
  func.func @transform_1(%arg0: i32) -> (i32, i32) {
    %c0_i32 = arith.constant 0 : i32
    %c0_i32_0 = arith.constant 0 : i32
    return %arg0, %c0_i32 : i32, i32
  }
  func.func @transform_2(%arg0: i32) -> (i32, i32) {
    %c0_i32 = arith.constant 0 : i32
    %c0_i32_0 = arith.constant 0 : i32
    return %arg0, %c0_i32 : i32, i32
  }
  func.func @transform_3(%arg0: i32) -> (i32, i32) {
    %c0_i32 = arith.constant 0 : i32
    %c0_i32_0 = arith.constant 0 : i32
    return %arg0, %c0_i32 : i32, i32
  }
  func.func @transform_4(%arg0: i32) -> (i32, i32) {
    %c0_i32 = arith.constant 0 : i32
    %c0_i32_0 = arith.constant 0 : i32
    return %arg0, %c0_i32 : i32, i32
  }
}

</mosaic_0001>

<bundles_post_ra>
// kernel: tpu_custom_call.1
= control target key start
LH: loop header
LB: loop body
LE: loop exit
PB: predicated region body
PF: predicated region fallthrough
CT: control target
= control target key end

     0   :  { %9 = vsyncpa [#allocation5], 0  ;;  %s326_s0 = inlined_call_operand.hbm [shape: f32[2], index: 0, kind: input, shape index: {}]   ;;  %s327_s1 = inlined_call_operand.hbm [shape: f32[8,1024], index: 1, kind: input, shape index: {}]   ;;  %s328_s2 = inlined_call_operand.hbm [shape: f32[8,1024], index: 2, kind: input, shape index: {}]   ;;  %s329_s3 = inlined_call_operand.hbm [shape: f32[8,1024], index: 3, kind: input, shape index: {}]   ;;  %s330_s4 = inlined_call_operand.hbm [shape: f32[8,1024], index: 4, kind: output, shape index: {}]  }
   0x1   :  { %10 = vsyncpa [#allocation3], 0 }
   0x2   :  { %11 = vsyncpa [#allocation8], 0  ;;  %s38_s17 = sshll.u32 %s328_s2, 4  ;;  %s39_s17 = int_to_ptr.hbm [resolvable:$true] %s38_s17 }
   0x3   :  { %12 = vsyncpa [#allocation4], 0  ;;  %s281_s18 = smov [#allocation7]   ;;  %s18_s22 = sshll.u32 %s326_s0, 4  ;;  %s19_s22 = int_to_ptr.hbm [resolvable:$true] %s18_s22 }
   0x4   :  { %s40_s19 = sshll.u32 %s281_s18, 4  ;;  %s282_s23 = smov [#allocation2]   ;;  %s41_s19 = int_to_ptr.vmem [resolvable:$true] %s40_s19 }
   0x5   :  { %43 = dma.hbm_to_vmem [thread:$0]  %s39_s17, 1024, %s41_s19, [#allocation8]  }
   0x6   :  { %21 = dma.hbm_to_smem %s19_s22, 16, %s282_s23, [#allocation5]  }
   0x7   :  { %s27_s26 = sshll.u32 %s327_s1, 4  ;;  %s283_s27 = smov [#allocation6]   ;;  %s28_s26 = int_to_ptr.hbm [resolvable:$true] %s27_s26 }
   0x8   :  { %s29_s2 = sshll.u32 %s283_s27, 4  ;;  %s49_s30 = sshll.u32 %s329_s3, 4  ;;  %s30_s2 = int_to_ptr.vmem [resolvable:$true] %s29_s2  ;;  %s50_s30 = int_to_ptr.hbm [resolvable:$true] %s49_s30 }
   0x9   :  { %32 = dma.hbm_to_vmem [thread:$0]  %s28_s26, 1024, %s30_s2, [#allocation3]  }
   0xa   :  { %s284_s5 = smov [#allocation9]  }
   0xb   :  { %s51_s0 = sshll.u32 %s284_s5, 4  ;;  %s52_s0 = int_to_ptr.vmem [resolvable:$true] %s51_s0 }
   0xc   :  { %54 = dma.hbm_to_vmem [thread:$0]  %s50_s30, 1024, %s52_s0, [#allocation8]  }
   0xd   :  { %273 = dma.done.wait [#allocation5], 16  }
   0xe   :  { %274 = vsyncadd [#allocation5], 4294967280 }
   0xf   :  { %275 = dma.done.wait [#allocation3], 1024  }
  0x10   :  { %276 = vsyncadd [#allocation3], 4294966272 }
  0x11   :  { %277 = dma.done.wait [#allocation8], 2048  }
  0x12   :  { %278 = vsyncadd [#allocation8], 4294965248 }
  0x13   :  { %71 = sfence }
  0x14   :  { %s72_s1 = sld [smem:[#allocation2]]  ;;  %v74_v0 = vld [vmem:[#allocation6] sm:$0xff]  ;;  %v75_v2 = vld [vmem:[#allocation6 + $0x8] sm:$0xff]  ;;  %v76_v4 = vld [vmem:[#allocation6 + $0x10] sm:$0xff]  ;;  %s285_s3 = smov [#allocation10]  }
  0x15   :  { %v82_v1 = vld [vmem:[#allocation7] sm:$0xff]  ;;  %s159_s6 = sld [smem:[#allocation2 + $0x1]]  ;;  %v83_v3 = vld [vmem:[#allocation7 + $0x8] sm:$0xff]  ;;  %v84_v5 = vld [vmem:[#allocation7 + $0x10] sm:$0xff]  ;;  %s145_s7 = sshll.u32 %s285_s3, 4  ;;  %s146_s7 = int_to_ptr.vmem [resolvable:$true] %s145_s7 }
  0x16   :  { %v90_v6 = vmul.f32 %v82_v1, %v74_v0  ;;  %v107_v7 = vld [vmem:[#allocation9] sm:$0xff]  ;;  %v91_v8 = vmul.f32 %v83_v3, %v75_v2  ;;  %v92_v9 = vmul.f32 %v84_v5, %v76_v4  ;;  %v77_v10 = vld [vmem:[#allocation6 + $0x18] sm:$0xff]  ;;  %v108_v12 = vld [vmem:[#allocation9 + $0x8] sm:$0xff]  ;;  %s147_s10 = sshll.u32 %s330_s4, 4  ;;  %s148_s10 = int_to_ptr.hbm [resolvable:$true] %s147_s10 }
  0x17   :  { %v85_v11 = vld [vmem:[#allocation7 + $0x18] sm:$0xff]  ;;  %v78_v14 = vld [vmem:[#allocation6 + $0x20] sm:$0xff]  ;;  %v109_v16 = vld [vmem:[#allocation9 + $0x10] sm:$0xff] }
  0x18   :  { %v93_v13 = vmul.f32 %v85_v11, %v77_v10  ;;  %v86_v15 = vld [vmem:[#allocation7 + $0x20] sm:$0xff]  ;;  %v79_v18 = vld [vmem:[#allocation6 + $0x28] sm:$0xff]  ;;  %v110_v21 = vld [vmem:[#allocation9 + $0x18] sm:$0xff] }
  0x19   :  { %v94_v17 = vmul.f32 %v86_v15, %v78_v14  ;;  %v87_v19 = vld [vmem:[#allocation7 + $0x28] sm:$0xff]  ;;  %v111_v22 = vld [vmem:[#allocation9 + $0x20] sm:$0xff]  ;;  %v80_v33 = vld [vmem:[#allocation6 + $0x30] sm:$0xff] }
  0x1a   :  { %v98_v20 = vstv %s72_s1  ;;  %v95_v23 = vmul.f32 %v87_v19, %v79_v18  ;;  %v112_v28 = vld [vmem:[#allocation9 + $0x28] sm:$0xff]  ;;  %v88_v34 = vld [vmem:[#allocation7 + $0x30] sm:$0xff]  ;;  %v81_v40 = vld [vmem:[#allocation6 + $0x38] sm:$0xff] }
  0x1b   :  { %v99_v24 = vmul.f32 %v98_v20, %v90_v6  ;;  %v115_v25 = vstv %s159_s6  ;;  %v100_v26 = vmul.f32 %v98_v20, %v91_v8  ;;  %v101_v27 = vmul.f32 %v98_v20, %v92_v9  ;;  %v113_v35 = vld [vmem:[#allocation9 + $0x30] sm:$0xff]  ;;  %v89_v41 = vld [vmem:[#allocation7 + $0x38] sm:$0xff] }
  0x1c   :  { %v116_v29 = vmul.f32 %v115_v25, %v107_v7  ;;  %v117_v30 = vmul.f32 %v115_v25, %v108_v12  ;;  %v118_v31 = vmul.f32 %v115_v25, %v109_v16  ;;  %v102_v32 = vmul.f32 %v98_v20, %v93_v13  ;;  %v114_v42 = vld [vmem:[#allocation9 + $0x38] sm:$0xff] }
  0x1d   :  { %v119_v36 = vmul.f32 %v115_v25, %v110_v21  ;;  %v103_v37 = vmul.f32 %v98_v20, %v94_v17  ;;  %v120_v38 = vmul.f32 %v115_v25, %v111_v22  ;;  %v104_v39 = vmul.f32 %v98_v20, %v95_v23 }
  0x1e   :  { %v124_v43 = vadd.f32 %v116_v29, %v99_v24  ;;  %v125_v44 = vadd.f32 %v117_v30, %v100_v26  ;;  %v126_v45 = vadd.f32 %v118_v31, %v101_v27  ;;  %v121_v46 = vmul.f32 %v115_v25, %v112_v28 }
  0x1f   :  { %v127_v47 = vadd.f32 %v119_v36, %v102_v32  ;;  %v96_v48 = vmul.f32 %v88_v34, %v80_v33  ;;  %v122_v49 = vmul.f32 %v115_v25, %v113_v35  ;;  %v128_v50 = vadd.f32 %v120_v38, %v103_v37 }
  0x20   :  { %132 = vst [vmem:[#allocation10] sm:$0xff] %v124_v43  ;;  %v97_v51 = vmul.f32 %v89_v41, %v81_v40  ;;  %v123_v52 = vmul.f32 %v115_v25, %v114_v42  ;;  %v129_v53 = vadd.f32 %v121_v46, %v104_v39 }
  0x21   :  { %133 = vst [vmem:[#allocation10 + $0x8] sm:$0xff] %v125_v44  ;;  %v105_v54 = vmul.f32 %v98_v20, %v96_v48 }
  0x22   :  { %134 = vst [vmem:[#allocation10 + $0x10] sm:$0xff] %v126_v45  ;;  %v106_v55 = vmul.f32 %v98_v20, %v97_v51 }
  0x23   :  { %135 = vst [vmem:[#allocation10 + $0x18] sm:$0xff] %v127_v47  ;;  %v130_v56 = vadd.f32 %v122_v49, %v105_v54 }
  0x24   :  { %136 = vst [vmem:[#allocation10 + $0x20] sm:$0xff] %v128_v50  ;;  %v131_v57 = vadd.f32 %v123_v52, %v106_v55 }
  0x25   :  { %137 = vst [vmem:[#allocation10 + $0x28] sm:$0xff] %v129_v53 }
  0x26   :  { %138 = vst [vmem:[#allocation10 + $0x30] sm:$0xff] %v130_v56 }
  0x27   :  { %139 = vst [vmem:[#allocation10 + $0x38] sm:$0xff] %v131_v57 }
  0x28   :  { %150 = dma.vmem_to_hbm [thread:$0]  %s146_s7, 1024, %s148_s10, [#allocation4]  }
  0x29   :  { %279 = dma.done.wait [#allocation4], 1024  }
  0x2a   :  { %280 = vsyncadd [#allocation4], 4294966272 }
  0x2b   :  { %155 = vsyncpa [#allocation3], 1 }
  0x2c   :  { %156 = vsyncpa [#allocation8], 1 }
  0x2d   :  { %157 = vsyncpa [#allocation4], 1 }
  0x2e   :  { %158 = vsyncpa [#allocation5], 1 }

</bundles_post_ra>
